<compile_context>
chip_gen: v6e
topology: v6e:2x2x1
jax: 0.10.0
libtpu: 0.0.40
codegen_flags: <defaults>
</compile_context>

<pallas_src>
import functools

import jax
import jax.numpy as jnp
from jax import lax
from jax.experimental import pallas as pl
from jax.experimental.pallas import tpu as pltpu

# Geometry implied by the module: conv1 is 3x3/stride-3, conv2 is 3x3/stride-1
# and flatten feeds fc1(num_channels)  =>  board is 9x9, conv1 out is 3x3,
# conv2 out is 1x1.
BOARD = 9
KSIZE = 3
NPATCH = (BOARD // KSIZE) ** 2  # 9
BN_EPS = 1e-5
LANE = 128
SUBLANE = 8
MAX_TB = 1024                   # batch-tile rows (few MiB working set << VMEM)


def _ceil_to(x, m):
    return (x + m - 1) // m * m


def ut3_kernel(num_actions,
               x_ref,
               w1_ref, t1_ref,
               w2_ref, t2_ref,
               w3_ref, t3_ref,
               w4_ref, t4_ref,
               wh_ref, bh_ref,
               out_ref):
    f32 = jnp.float32
    bf16 = jnp.bfloat16

    x = x_ref[...]                                               # (TB, KTp) bf16

    # conv1 + bn1 + relu : one matmul covering all 9 patches (tight-packed cols)
    h1 = jnp.dot(x, w1_ref[...], preferred_element_type=f32)     # (TB, H1p)
    h1 = jnp.maximum(h1 + t1_ref[...], 0.0)

    # conv2 + bn2 + relu : 3x3 kernel over the whole 3x3 conv1 map -> one matmul
    h2 = jnp.dot(h1.astype(bf16), w2_ref[...], preferred_element_type=f32)
    h2 = jnp.maximum(h2 + t2_ref[...], 0.0)                      # (TB, NCp)

    # fc1 + fc_bn1 + relu   (dropout = identity in eval mode)
    h3 = jnp.dot(h2.astype(bf16), w3_ref[...], preferred_element_type=f32)
    h3 = jnp.maximum(h3 + t3_ref[...], 0.0)                      # (TB, LHp)

    # fc2 + fc_bn2 + relu
    h4 = jnp.dot(h3.astype(bf16), w4_ref[...], preferred_element_type=f32)
    h4 = jnp.maximum(h4 + t4_ref[...], 0.0)                      # (TB, LHp)

    # fused policy/value head: lanes [0, A) = fc3 logits, lane A = fc4 logit
    logits = jnp.dot(h4.astype(bf16), wh_ref[...],
                     preferred_element_type=f32) + bh_ref[...]   # (TB, Ap)
    tb, ap = logits.shape
    lane = lax.broadcasted_iota(jnp.int32, (tb, ap), 1)
    pmask = lane < num_actions

    # log_softmax over the first `num_actions` lanes only (padded lanes masked)
    masked = jnp.where(pmask, logits, -jnp.inf)
    m = jnp.max(masked, axis=1, keepdims=True)
    z = masked - m
    lse = jnp.log(jnp.sum(jnp.exp(z), axis=1, keepdims=True))
    log_pi = z - lse

    # value head = tanh(lane A)
    v_logit = jnp.sum(jnp.where(lane == num_actions, logits, 0.0),
                      axis=1, keepdims=True)                     # (TB, 1)
    v = jnp.tanh(v_logit)

    out = jnp.where(pmask, log_pi, 0.0)
    out = jnp.where(lane == num_actions, v, out)
    out_ref[...] = out                                           # lane-dense (TB, Ap)


def _fold_bn(gamma, beta, mean, var, bias):
    """Fold eval-mode BatchNorm and the preceding layer's bias into (scale, shift)."""
    s = gamma / jnp.sqrt(var + BN_EPS)
    t = (bias - mean) * s + beta
    return s.astype(jnp.float32), t.astype(jnp.float32)


def _pad2(a, rows, cols):
    return jnp.zeros((rows, cols), jnp.float32).at[:a.shape[0], :a.shape[1]].set(a)


def _pad_row(v, cols):
    return jnp.zeros((1, cols), jnp.float32).at[0, :v.shape[0]].set(v)


def prepare_params(P):
    """One-time weight repack (runs eagerly, NOT per forward call).

    Returns (weights_tuple, num_actions). BN scales are folded into the bf16
    weights; the im2col patch permutation is baked into W1's row order so the
    forward only needs x.reshape(B, C*81).
    """
    NC, C = P["conv1_w"].shape[:2]
    LH = P["fc1_w"].shape[0]
    A = P["fc3_w"].shape[0]

    K1 = C * KSIZE * KSIZE                 # per-patch feature width
    KT = C * BOARD * BOARD                 # natural NCHW flatten width (324)
    KTp = _ceil_to(KT, LANE)               # 384
    H1 = NPATCH * NC                       # tight-packed conv1 width (288)
    H1p = _ceil_to(H1, LANE)               # 384
    NCp = _ceil_to(NC, LANE)
    LHp = _ceil_to(LH, LANE)
    Ap = _ceil_to(A + 1, LANE)             # policy lanes + value lane, padded

    f32 = jnp.float32

    # ---- conv1 + bn1: scale folded into weights, rows in natural NCHW order ----
    s1, t1 = _fold_bn(P["bn1_g"], P["bn1_b"], P["bn1_m"], P["bn1_v"], P["conv1_b"])
    w1s = P["conv1_w"].astype(f32) * s1[:, None, None, None]      # (oc, ic, kh, kw)
    blk1 = w1s.transpose(1, 2, 3, 0).reshape(K1, NC)               # rows (c, ki, kj)
    W1 = jnp.zeros((KTp, H1p), f32)
    for p in range(NPATCH):
        pi, pj = divmod(p, BOARD // KSIZE)
        rows = (jnp.arange(C)[:, None, None] * (BOARD * BOARD)
                + (KSIZE * pi + jnp.arange(KSIZE))[None, :, None] * BOARD
                + (KSIZE * pj + jnp.arange(KSIZE))[None, None, :]).reshape(-1)
        cols = p * NC + jnp.arange(NC)
        W1 = W1.at[rows[:, None], cols[None, :]].set(blk1)
    T1 = _pad_row(jnp.tile(t1, NPATCH), H1p)

    # ---- conv2 + bn2: all 9 taps folded into one (H1p, NCp) matrix ----
    s2, t2 = _fold_bn(P["bn2_g"], P["bn2_b"], P["bn2_m"], P["bn2_v"], P["conv2_b"])
    w2s = P["conv2_w"].astype(f32) * s2[:, None, None, None]      # (oc, ic, kh, kw)
    w2r = w2s.transpose(2, 3, 1, 0).reshape(NPATCH * NC, NC)       # (p*NC+ic, oc)
    W2 = jnp.zeros((H1p, NCp), f32).at[:NPATCH * NC, :NC].set(w2r)
    T2 = _pad_row(t2, NCp)

    # ---- fc1 / fc2 (BN scale folded into columns) ----
    s3, t3 = _fold_bn(P["fbn1_g"], P["fbn1_b"], P["fbn1_m"], P["fbn1_v"], P["fc1_b"])
    W3 = _pad2(P["fc1_w"].T * s3[None, :], NCp, LHp)
    T3 = _pad_row(t3, LHp)
    s4, t4 = _fold_bn(P["fbn2_g"], P["fbn2_b"], P["fbn2_m"], P["fbn2_v"], P["fc2_b"])
    W4 = _pad2(P["fc2_w"].T * s4[None, :], LHp, LHp)
    T4 = _pad_row(t4, LHp)

    # ---- fused policy+value head: lanes [0,A) = fc3, lane A = fc4 ----
    WH = jnp.zeros((LHp, Ap), f32)
    WH = WH.at[:LH, :A].set(P["fc3_w"].T)
    WH = WH.at[:LH, A:A + 1].set(P["fc4_w"].T)
    BH = (jnp.zeros((1, Ap), f32)
          .at[0, :A].set(P["fc3_b"]).at[0, A].set(P["fc4_b"][0]))

    bf = jnp.bfloat16
    weights = (W1.astype(bf), T1, W2.astype(bf), T2, W3.astype(bf), T3,
               W4.astype(bf), T4, WH.astype(bf), BH)
    return jax.block_until_ready(weights), A


@functools.partial(jax.jit, static_argnames=("num_actions",))
def ut3_forward(x, weights, num_actions):
    """x: (B, C, 9, 9) float32 NCHW; weights from prepare_params().
    Returns (log_pi (B, A), v (B, 1)) in eval mode."""
    W1, T1, W2, T2, W3, T3, W4, T4, WH, BH = weights
    B, C, H, W = x.shape
    assert H == BOARD and W == BOARD
    KTp = W1.shape[0]
    Ap = WH.shape[1]
    H1p = W1.shape[1]
    NCp = W2.shape[1]
    LHp = W3.shape[1]

    # ---- batch tiling: >=2 grid steps (v7x dual-TC) with <=1 sublane padding ----
    Bpad0 = _ceil_to(B, SUBLANE)
    min_steps = 2 if Bpad0 > SUBLANE else 1
    steps = max(pl.cdiv(Bpad0, MAX_TB), min_steps)
    TB = _ceil_to(pl.cdiv(Bpad0, steps), SUBLANE)
    grid = pl.cdiv(Bpad0, TB)
    Bpad = grid * TB

    # ---- natural NCHW flatten + pad + bf16 cast (im2col lives in W1's rows) ----
    xflat = x.reshape(B, C * BOARD * BOARD).astype(jnp.bfloat16)
    patches = (jnp.zeros((Bpad, KTp), jnp.bfloat16)
               .at[:B, :xflat.shape[1]].set(xflat))

    weight_ops = (W1, T1, W2, T2, W3, T3, W4, T4, WH, BH)
    w_specs = [pl.BlockSpec(w.shape, lambda i: (0, 0)) for w in weight_ops]

    flops = 2 * Bpad * (KTp * H1p + H1p * NCp + NCp * LHp + LHp * LHp + LHp * Ap)
    bytes_accessed = (Bpad * KTp * 2 + Bpad * Ap * 4
                      + sum(int(w.size) * w.dtype.itemsize for w in weight_ops))
    cost = pl.CostEstimate(flops=flops,
                           transcendentals=Bpad * (Ap + 2),
                           bytes_accessed=bytes_accessed)

    out = pl.pallas_call(
        functools.partial(ut3_kernel, num_actions),
        out_shape=jax.ShapeDtypeStruct((Bpad, Ap), jnp.float32),
        grid_spec=pltpu.PrefetchScalarGridSpec(
            num_scalar_prefetch=0,
            grid=(grid,),
            in_specs=[pl.BlockSpec((TB, KTp), lambda i: (i, 0))] + w_specs,
            out_specs=pl.BlockSpec((TB, Ap), lambda i: (i, 0)),
        ),
        compiler_params=pltpu.CompilerParams(
            dimension_semantics=("parallel",),
            vmem_limit_bytes=32 * 1024 * 1024),
        cost_estimate=cost,
    )(patches, *weight_ops)

    return out[:B, :num_actions], out[:B, num_actions:num_actions + 1]


def ref_forward(x, P):
    """Pure-JAX reference reproducing the PyTorch eval-mode forward."""
    def bn2d(y, g, b, m, v):
        return ((y - m[None, :, None, None]) / jnp.sqrt(v[None, :, None, None] + BN_EPS)
                * g[None, :, None, None] + b[None, :, None, None])

    def bn1d(y, g, b, m, v):
        return (y - m) / jnp.sqrt(v + BN_EPS) * g + b

    dn = ("NCHW", "OIHW", "NCHW")
    y = jax.lax.conv_general_dilated(x, P["conv1_w"], (3, 3), "VALID",
                                     dimension_numbers=dn) + P["conv1_b"][None, :, None, None]
    y = jax.nn.relu(bn2d(y, P["bn1_g"], P["bn1_b"], P["bn1_m"], P["bn1_v"]))
    y = jax.lax.conv_general_dilated(y, P["conv2_w"], (1, 1), "VALID",
                                     dimension_numbers=dn) + P["conv2_b"][None, :, None, None]
    y = jax.nn.relu(bn2d(y, P["bn2_g"], P["bn2_b"], P["bn2_m"], P["bn2_v"]))
    y = y.reshape(y.shape[0], -1)
    y = jax.nn.relu(bn1d(y @ P["fc1_w"].T + P["fc1_b"],
                         P["fbn1_g"], P["fbn1_b"], P["fbn1_m"], P["fbn1_v"]))
    y = jax.nn.relu(bn1d(y @ P["fc2_w"].T + P["fc2_b"],
                         P["fbn2_g"], P["fbn2_b"], P["fbn2_m"], P["fbn2_v"]))
    pi = y @ P["fc3_w"].T + P["fc3_b"]
    v = jnp.tanh(y @ P["fc4_w"].T + P["fc4_b"])
    return jax.nn.log_softmax(pi, axis=1), v


def init_params(key, channels, num_channels, linear_hiddens, action_size):
    ks = jax.random.split(key, 24)
    n = lambda k, shape, s=0.1: (s * jax.random.normal(k, shape)).astype(jnp.float32)
    P = {
        "conv1_w": n(ks[0], (num_channels, channels, 3, 3)),
        "conv1_b": n(ks[1], (num_channels,)),
        "conv2_w": n(ks[2], (num_channels, num_channels, 3, 3)),
        "conv2_b": n(ks[3], (num_channels,)),
        "fc1_w": n(ks[4], (linear_hiddens, num_channels)),
        "fc1_b": n(ks[5], (linear_hiddens,)),
        "fc2_w": n(ks[6], (linear_hiddens, linear_hiddens)),
        "fc2_b": n(ks[7], (linear_hiddens,)),
        "fc3_w": n(ks[8], (action_size, linear_hiddens)),
        "fc3_b": n(ks[9], (action_size,)),
        "fc4_w": n(ks[10], (1, linear_hiddens)),
        "fc4_b": n(ks[11], (1,)),
    }
    def bn(k1, k2, k3, k4, dim):
        return (1.0 + n(k1, (dim,)),          # gamma
                n(k2, (dim,)),                # beta
                n(k3, (dim,)),                # running_mean
                1.0 + jnp.abs(n(k4, (dim,)))) # running_var
    P["bn1_g"], P["bn1_b"], P["bn1_m"], P["bn1_v"] = bn(ks[12], ks[13], ks[14], ks[15], num_channels)
    P["bn2_g"], P["bn2_b"], P["bn2_m"], P["bn2_v"] = bn(ks[16], ks[17], ks[18], ks[19], num_channels)
    P["fbn1_g"], P["fbn1_b"], P["fbn1_m"], P["fbn1_v"] = bn(ks[20], ks[21], ks[22], ks[23], linear_hiddens)
    k2 = jax.random.split(ks[23], 4)
    P["fbn2_g"], P["fbn2_b"], P["fbn2_m"], P["fbn2_v"] = bn(k2[0], k2[1], k2[2], k2[3], linear_hiddens)
    return P


if __name__ == "__main__":
    # Small, module-consistent sizes: 9x9 board, 4 input planes, 32 conv
    # channels, 32 linear hiddens, 81 actions, batch 2.
    B, C, NC, LH, A = 2, 4, 32, 32, 81
    key = jax.random.PRNGKey(0)
    kx, kp = jax.random.split(key)
    x = jax.random.normal(kx, (B, C, BOARD, BOARD), dtype=jnp.float32)
    P = init_params(kp, C, NC, LH, A)

    # One-time weight repack (hoisted out of the per-call jit).
    weights, num_actions = prepare_params(P)

    log_pi, v = ut3_forward(x, weights, num_actions=num_actions)
    jax.block_until_ready((log_pi, v))

    ref_pi, ref_v = ref_forward(x, P)
    assert log_pi.shape == (B, A) and v.shape == (B, 1)
    # bf16 MXU operands (BN scale folded into bf16 weights) -> loose tolerance.
    assert jnp.allclose(log_pi, ref_pi, atol=3e-2, rtol=3e-2), \
        float(jnp.max(jnp.abs(log_pi - ref_pi)))
    assert jnp.allclose(v, ref_v, atol=3e-2, rtol=3e-2), \
        float(jnp.max(jnp.abs(v - ref_v)))
    print("KERNEL_OK")
</pallas_src>

<mosaic_0001>
module attributes {stable_mosaic.version = 11 : i64} {
  func.func @ut3_kernel(%arg0: i32, %arg1: memref<8x384xbf16, #tpu.memory_space<vmem>>, %arg2: memref<384x384xbf16, #tpu.memory_space<vmem>>, %arg3: memref<1x384xf32, #tpu.memory_space<vmem>>, %arg4: memref<384x128xbf16, #tpu.memory_space<vmem>>, %arg5: memref<1x128xf32, #tpu.memory_space<vmem>>, %arg6: memref<128x128xbf16, #tpu.memory_space<vmem>>, %arg7: memref<1x128xf32, #tpu.memory_space<vmem>>, %arg8: memref<128x128xbf16, #tpu.memory_space<vmem>>, %arg9: memref<1x128xf32, #tpu.memory_space<vmem>>, %arg10: memref<128x128xbf16, #tpu.memory_space<vmem>>, %arg11: memref<1x128xf32, #tpu.memory_space<vmem>>, %arg12: memref<8x128xf32, #tpu.memory_space<vmem>>) attributes {dimension_semantics = [#tpu.dimension_semantics<parallel>], iteration_bounds = array<i64: 1>, scalar_prefetch = 0 : i64, scratch_operands = 0 : i64, tpu.core_type = #tpu.core_type<tc>, window_params = [{transform_indices = @transform_0, window_bounds = array<i64: 8, 384>}, {pipeline_mode = #tpu.pipeline_mode<synchronous>, transform_indices = @transform_1, window_bounds = array<i64: 384, 384>}, {pipeline_mode = #tpu.pipeline_mode<synchronous>, transform_indices = @transform_2, window_bounds = array<i64: 1, 384>}, {pipeline_mode = #tpu.pipeline_mode<synchronous>, transform_indices = @transform_3, window_bounds = array<i64: 384, 128>}, {pipeline_mode = #tpu.pipeline_mode<synchronous>, transform_indices = @transform_4, window_bounds = array<i64: 1, 128>}, {pipeline_mode = #tpu.pipeline_mode<synchronous>, transform_indices = @transform_5, window_bounds = array<i64: 128, 128>}, {pipeline_mode = #tpu.pipeline_mode<synchronous>, transform_indices = @transform_6, window_bounds = array<i64: 1, 128>}, {pipeline_mode = #tpu.pipeline_mode<synchronous>, transform_indices = @transform_7, window_bounds = array<i64: 128, 128>}, {pipeline_mode = #tpu.pipeline_mode<synchronous>, transform_indices = @transform_8, window_bounds = array<i64: 1, 128>}, {pipeline_mode = #tpu.pipeline_mode<synchronous>, transform_indices = @transform_9, window_bounds = array<i64: 128, 128>}, {pipeline_mode = #tpu.pipeline_mode<synchronous>, transform_indices = @transform_10, window_bounds = array<i64: 1, 128>}, {transform_indices = @transform_11, window_bounds = array<i64: 8, 128>}]} {
    %c0 = arith.constant 0 : index
    %c0_0 = arith.constant 0 : index
    %0 = vector.load %arg1[%c0, %c0_0] : memref<8x384xbf16, #tpu.memory_space<vmem>>, vector<8x384xbf16>
    %c0_1 = arith.constant 0 : index
    %c0_2 = arith.constant 0 : index
    %1 = vector.load %arg2[%c0_1, %c0_2] : memref<384x384xbf16, #tpu.memory_space<vmem>>, vector<384x384xbf16>
    %cst = arith.constant dense<0.000000e+00> : vector<8x384xf32>
    %2 = tpu.matmul %0, %1, %cst {dimension_numbers = #tpu.dot_dimension_numbers<[1], [0], [0], [1], [0, 0, 1, 1], [], []>} : vector<8x384xbf16>, vector<384x384xbf16>, vector<8x384xf32> -> vector<8x384xf32>
    %c0_3 = arith.constant 0 : index
    %c0_4 = arith.constant 0 : index
    %3 = vector.load %arg3[%c0_3, %c0_4] : memref<1x384xf32, #tpu.memory_space<vmem>>, vector<1x384xf32>
    %4 = vector.broadcast %3 : vector<1x384xf32> to vector<8x384xf32>
    %5 = arith.addf %2, %4 : vector<8x384xf32>
    %cst_5 = arith.constant 0.000000e+00 : f32
    %6 = vector.broadcast %cst_5 : f32 to vector<8x384xf32>
    %7 = arith.maximumf %5, %6 : vector<8x384xf32>
    %8 = arith.truncf %7 : vector<8x384xf32> to vector<8x384xbf16>
    %c0_6 = arith.constant 0 : index
    %c0_7 = arith.constant 0 : index
    %9 = vector.load %arg4[%c0_6, %c0_7] : memref<384x128xbf16, #tpu.memory_space<vmem>>, vector<384x128xbf16>
    %cst_8 = arith.constant dense<0.000000e+00> : vector<8x128xf32>
    %10 = tpu.matmul %8, %9, %cst_8 {dimension_numbers = #tpu.dot_dimension_numbers<[1], [0], [0], [1], [0, 0, 1, 1], [], []>} : vector<8x384xbf16>, vector<384x128xbf16>, vector<8x128xf32> -> vector<8x128xf32>
    %c0_9 = arith.constant 0 : index
    %c0_10 = arith.constant 0 : index
    %11 = vector.load %arg5[%c0_9, %c0_10] : memref<1x128xf32, #tpu.memory_space<vmem>>, vector<1x128xf32>
    %12 = vector.broadcast %11 : vector<1x128xf32> to vector<8x128xf32>
    %13 = arith.addf %10, %12 : vector<8x128xf32>
    %cst_11 = arith.constant 0.000000e+00 : f32
    %14 = vector.broadcast %cst_11 : f32 to vector<8x128xf32>
    %15 = arith.maximumf %13, %14 : vector<8x128xf32>
    %16 = arith.truncf %15 : vector<8x128xf32> to vector<8x128xbf16>
    %c0_12 = arith.constant 0 : index
    %c0_13 = arith.constant 0 : index
    %17 = vector.load %arg6[%c0_12, %c0_13] : memref<128x128xbf16, #tpu.memory_space<vmem>>, vector<128x128xbf16>
    %cst_14 = arith.constant dense<0.000000e+00> : vector<8x128xf32>
    %18 = tpu.matmul %16, %17, %cst_14 {dimension_numbers = #tpu.dot_dimension_numbers<[1], [0], [0], [1], [0, 0, 1, 1], [], []>} : vector<8x128xbf16>, vector<128x128xbf16>, vector<8x128xf32> -> vector<8x128xf32>
    %c0_15 = arith.constant 0 : index
    %c0_16 = arith.constant 0 : index
    %19 = vector.load %arg7[%c0_15, %c0_16] : memref<1x128xf32, #tpu.memory_space<vmem>>, vector<1x128xf32>
    %20 = vector.broadcast %19 : vector<1x128xf32> to vector<8x128xf32>
    %21 = arith.addf %18, %20 : vector<8x128xf32>
    %cst_17 = arith.constant 0.000000e+00 : f32
    %22 = vector.broadcast %cst_17 : f32 to vector<8x128xf32>
    %23 = arith.maximumf %21, %22 : vector<8x128xf32>
    %24 = arith.truncf %23 : vector<8x128xf32> to vector<8x128xbf16>
    %c0_18 = arith.constant 0 : index
    %c0_19 = arith.constant 0 : index
    %25 = vector.load %arg8[%c0_18, %c0_19] : memref<128x128xbf16, #tpu.memory_space<vmem>>, vector<128x128xbf16>
    %cst_20 = arith.constant dense<0.000000e+00> : vector<8x128xf32>
    %26 = tpu.matmul %24, %25, %cst_20 {dimension_numbers = #tpu.dot_dimension_numbers<[1], [0], [0], [1], [0, 0, 1, 1], [], []>} : vector<8x128xbf16>, vector<128x128xbf16>, vector<8x128xf32> -> vector<8x128xf32>
    %c0_21 = arith.constant 0 : index
    %c0_22 = arith.constant 0 : index
    %27 = vector.load %arg9[%c0_21, %c0_22] : memref<1x128xf32, #tpu.memory_space<vmem>>, vector<1x128xf32>
    %28 = vector.broadcast %27 : vector<1x128xf32> to vector<8x128xf32>
    %29 = arith.addf %26, %28 : vector<8x128xf32>
    %cst_23 = arith.constant 0.000000e+00 : f32
    %30 = vector.broadcast %cst_23 : f32 to vector<8x128xf32>
    %31 = arith.maximumf %29, %30 : vector<8x128xf32>
    %32 = arith.truncf %31 : vector<8x128xf32> to vector<8x128xbf16>
    %c0_24 = arith.constant 0 : index
    %c0_25 = arith.constant 0 : index
    %33 = vector.load %arg10[%c0_24, %c0_25] : memref<128x128xbf16, #tpu.memory_space<vmem>>, vector<128x128xbf16>
    %cst_26 = arith.constant dense<0.000000e+00> : vector<8x128xf32>
    %34 = tpu.matmul %32, %33, %cst_26 {dimension_numbers = #tpu.dot_dimension_numbers<[1], [0], [0], [1], [0, 0, 1, 1], [], []>} : vector<8x128xbf16>, vector<128x128xbf16>, vector<8x128xf32> -> vector<8x128xf32>
    %c0_27 = arith.constant 0 : index
    %c0_28 = arith.constant 0 : index
    %35 = vector.load %arg11[%c0_27, %c0_28] : memref<1x128xf32, #tpu.memory_space<vmem>>, vector<1x128xf32>
    %36 = vector.broadcast %35 : vector<1x128xf32> to vector<8x128xf32>
    %37 = arith.addf %34, %36 : vector<8x128xf32>
    %38 = tpu.iota {dimensions = array<i32: 1>} : vector<8x128xi32>
    %c81_i32 = arith.constant 81 : i32
    %39 = vector.broadcast %c81_i32 : i32 to vector<8x128xi32>
    %40 = arith.cmpi slt, %38, %39 : vector<8x128xi32>
    %cst_29 = arith.constant 0xFF800000 : f32
    %41 = vector.broadcast %cst_29 : f32 to vector<8x128xf32>
    %42 = arith.select %40, %37, %41 : vector<8x128xi1>, vector<8x128xf32>
    %cst_30 = arith.constant dense<0xFF800000> : vector<8xf32>
    %43 = vector.multi_reduction <maximumf>, %42, %cst_30 [1] : vector<8x128xf32> to vector<8xf32>
    %44 = vector.shape_cast %43 : vector<8xf32> to vector<8x1xf32>
    %45 = vector.broadcast %44 : vector<8x1xf32> to vector<8x128xf32>
    %46 = arith.subf %42, %45 : vector<8x128xf32>
    %47 = math.exp %46 : vector<8x128xf32>
    %cst_31 = arith.constant dense<0.000000e+00> : vector<8xf32>
    %48 = vector.multi_reduction <add>, %47, %cst_31 [1] : vector<8x128xf32> to vector<8xf32>
    %49 = vector.shape_cast %48 : vector<8xf32> to vector<8x1xf32>
    %50 = math.log %49 : vector<8x1xf32>
    %51 = vector.broadcast %50 : vector<8x1xf32> to vector<8x128xf32>
    %52 = arith.subf %46, %51 : vector<8x128xf32>
    %c81_i32_32 = arith.constant 81 : i32
    %53 = vector.broadcast %c81_i32_32 : i32 to vector<8x128xi32>
    %54 = arith.cmpi eq, %38, %53 : vector<8x128xi32>
    %cst_33 = arith.constant 0.000000e+00 : f32
    %55 = vector.broadcast %cst_33 : f32 to vector<8x128xf32>
    %56 = arith.select %54, %37, %55 : vector<8x128xi1>, vector<8x128xf32>
    %cst_34 = arith.constant dense<0.000000e+00> : vector<8xf32>
    %57 = vector.multi_reduction <add>, %56, %cst_34 [1] : vector<8x128xf32> to vector<8xf32>
    %58 = vector.shape_cast %57 : vector<8xf32> to vector<8x1xf32>
    %59 = math.tanh %58 : vector<8x1xf32>
    %cst_35 = arith.constant 0.000000e+00 : f32
    %60 = vector.broadcast %cst_35 : f32 to vector<8x128xf32>
    %61 = arith.select %40, %52, %60 : vector<8x128xi1>, vector<8x128xf32>
    %c81_i32_36 = arith.constant 81 : i32
    %62 = vector.broadcast %c81_i32_36 : i32 to vector<8x128xi32>
    %63 = arith.cmpi eq, %38, %62 : vector<8x128xi32>
    %64 = vector.shape_cast %59 : vector<8x1xf32> to vector<8x1xf32>
    %65 = vector.broadcast %64 : vector<8x1xf32> to vector<8x128xf32>
    %66 = arith.select %63, %65, %61 : vector<8x128xi1>, vector<8x128xf32>
    %c0_37 = arith.constant 0 : index
    %c0_38 = arith.constant 0 : index
    %67 = vector.load %arg12[%c0_37, %c0_38] : memref<8x128xf32, #tpu.memory_space<vmem>>, vector<8x128xf32>
    tpu.vector_store %arg12[%c0_37, %c0_38], %66 {strides = array<i32>} : memref<8x128xf32, #tpu.memory_space<vmem>>, vector<8x128xf32>,
    return
  }
  func.func @transform_0(%arg0: i32) -> (i32, i32) {
    %c0_i32 = arith.constant 0 : i32
    %c0_i32_0 = arith.constant 0 : i32
    return %arg0, %c0_i32 : i32, i32
  }
  func.func @transform_1(%arg0: i32) -> (i32, i32) {
    %c0_i32 = arith.constant 0 : i32
    %c0_i32_0 = arith.constant 0 : i32
    %c0_i32_1 = arith.constant 0 : i32
    return %c0_i32, %c0_i32_0 : i32, i32
  }
  func.func @transform_2(%arg0: i32) -> (i32, i32) {
    %c0_i32 = arith.constant 0 : i32
    %c0_i32_0 = arith.constant 0 : i32
    %c0_i32_1 = arith.constant 0 : i32
    return %c0_i32, %c0_i32_0 : i32, i32
  }
  func.func @transform_3(%arg0: i32) -> (i32, i32) {
    %c0_i32 = arith.constant 0 : i32
    %c0_i32_0 = arith.constant 0 : i32
    %c0_i32_1 = arith.constant 0 : i32
    return %c0_i32, %c0_i32_0 : i32, i32
  }
  func.func @transform_4(%arg0: i32) -> (i32, i32) {
    %c0_i32 = arith.constant 0 : i32
    %c0_i32_0 = arith.constant 0 : i32
    %c0_i32_1 = arith.constant 0 : i32
    return %c0_i32, %c0_i32_0 : i32, i32
  }
  func.func @transform_5(%arg0: i32) -> (i32, i32) {
    %c0_i32 = arith.constant 0 : i32
    %c0_i32_0 = arith.constant 0 : i32
    %c0_i32_1 = arith.constant 0 : i32
    return %c0_i32, %c0_i32_0 : i32, i32
  }
  func.func @transform_6(%arg0: i32) -> (i32, i32) {
    %c0_i32 = arith.constant 0 : i32
    %c0_i32_0 = arith.constant 0 : i32
    %c0_i32_1 = arith.constant 0 : i32
    return %c0_i32, %c0_i32_0 : i32, i32
  }
  func.func @transform_7(%arg0: i32) -> (i32, i32) {
    %c0_i32 = arith.constant 0 : i32
    %c0_i32_0 = arith.constant 0 : i32
    %c0_i32_1 = arith.constant 0 : i32
    return %c0_i32, %c0_i32_0 : i32, i32
  }
  func.func @transform_8(%arg0: i32) -> (i32, i32) {
    %c0_i32 = arith.constant 0 : i32
    %c0_i32_0 = arith.constant 0 : i32
    %c0_i32_1 = arith.constant 0 : i32
    return %c0_i32, %c0_i32_0 : i32, i32
  }
  func.func @transform_9(%arg0: i32) -> (i32, i32) {
    %c0_i32 = arith.constant 0 : i32
    %c0_i32_0 = arith.constant 0 : i32
    %c0_i32_1 = arith.constant 0 : i32
    return %c0_i32, %c0_i32_0 : i32, i32
  }
  func.func @transform_10(%arg0: i32) -> (i32, i32) {
    %c0_i32 = arith.constant 0 : i32
    %c0_i32_0 = arith.constant 0 : i32
    %c0_i32_1 = arith.constant 0 : i32
    return %c0_i32, %c0_i32_0 : i32, i32
  }
  func.func @transform_11(%arg0: i32) -> (i32, i32) {
    %c0_i32 = arith.constant 0 : i32
    %c0_i32_0 = arith.constant 0 : i32
    return %arg0, %c0_i32 : i32, i32
  }
}

</mosaic_0001>

<bundles_post_ra>
// kernel: ut3_forward.1
= control target key start
LH: loop header
LB: loop body
LE: loop exit
PB: predicated region body
PF: predicated region fallthrough
CT: control target
= control target key end

     0   :  { %16 = vsyncpa [#allocation3], 0  ;;  %s2206_s0 = inlined_call_operand.vmem [shape: bf16[8,384], index: 0, kind: input, shape index: {}]   ;;  %s2207_s1 = inlined_call_operand.hbm [shape: bf16[384,384], index: 1, kind: input, shape index: {}]   ;;  %s2208_s2 = inlined_call_operand.vmem [shape: f32[1,384], index: 2, kind: input, shape index: {}]   ;;  %s2209_s3 = inlined_call_operand.vmem [shape: bf16[384,128], index: 3, kind: input, shape index: {}]   ;;  %s2210_s4 = inlined_call_operand.vmem [shape: f32[1,128], index: 4, kind: input, shape index: {}]   ;;  %s2211_s5 = inlined_call_operand.vmem [shape: bf16[128,128], index: 5, kind: input, shape index: {}]   ;;  %s2212_s6 = inlined_call_operand.vmem [shape: f32[1,128], index: 6, kind: input, shape index: {}]   ;;  %s2213_s7 = inlined_call_operand.hbm [shape: bf16[128,128], index: 7, kind: input, shape index: {}]   ;;  %s2214_s8 = inlined_call_operand.vmem [shape: f32[1,128], index: 8, kind: input, shape index: {}]   ;;  %s2215_s9 = inlined_call_operand.hbm [shape: bf16[128,128], index: 9, kind: input, shape index: {}]   ;;  %s2216_s10 = inlined_call_operand.vmem [shape: f32[1,128], index: 10, kind: input, shape index: {}]   ;;  %s2217_s11 = inlined_call_operand.vmem [shape: f32[8,128], index: 11, kind: output, shape index: {}]  }
   0x1   :  { %17 = vsyncpa [#allocation5], 0  ;;  %s1947_s17 = smov [#allocation4]  }
   0x2   :  { %s47_s18 = sshll.u32 %s1947_s17, 4  ;;  %s48_s18 = int_to_ptr.vmem [resolvable:$true] %s47_s18 }
   0x3   :  { %s1891_s19 = scalar_lea.vmem %s48_s18, 1024  ;;  %p1896_p1 = scmp.lt.s32.totalorder %s48_s18, %s48_s18 }
   0x4   :  { %p1892_p0 = scmp.ne.s32.totalorder %s48_s18, %s1891_s19  ;;  %p1897_p2 = scmp.lt.s32.totalorder %s1891_s19, %s1891_s19 }
   0x6   :  { %p1898_p3 = por %p1897_p2, %p1896_p1 }
   0x8   :  { %p1899_p4 = pnand %p1898_p3, %p1892_p0 }
   0xa   :  { %1902 = shalt.err (!%p1899_p4)
}
   0xb   :  { %s1948_s20 = smov 64   ;;  %s1949_s21 = smov 4  }
   0xc   :  { %53 = dma.hbm_to_vmem [thread:$0]  %s2213_s7, 1024, %s48_s18, [#allocation5], %s1948_s20, %s1948_s20, %s1949_s21  }
   0xd   :  { %s1950_s24 = smov [#allocation2]  }
   0xe   :  { %s25_s25 = sshll.u32 %s1950_s24, 4  ;;  %s26_s25 = int_to_ptr.vmem [resolvable:$true] %s25_s25 }
   0xf   :  { %s1911_s26 = scalar_lea.vmem %s26_s25, 9216  ;;  %p1916_p6 = scmp.lt.s32.totalorder %s26_s25, %s26_s25 }
  0x10   :  { %p1912_p5 = scmp.ne.s32.totalorder %s26_s25, %s1911_s26  ;;  %p1917_p7 = scmp.lt.s32.totalorder %s1911_s26, %s1911_s26 }
  0x12   :  { %p1918_p8 = por %p1917_p7, %p1916_p6 }
  0x14   :  { %p1919_p9 = pnand %p1918_p8, %p1912_p5 }
  0x16   :  { %1922 = shalt.err (!%p1919_p9)
}
  0x17   :  { %s1951_s27 = smov 192   ;;  %s1952_s28 = smov 12  }
  0x18   :  { %31 = dma.hbm_to_vmem [thread:$0]  %s2207_s1, 9216, %s26_s25, [#allocation3], %s1951_s27, %s1951_s27, %s1952_s28  }
  0x19   :  { %s1953_s12 = smov [#allocation6]  }
  0x1a   :  { %s61_s13 = sshll.u32 %s1953_s12, 4  ;;  %s62_s13 = int_to_ptr.vmem [resolvable:$true] %s61_s13 }
  0x1b   :  { %s1931_s7 = scalar_lea.vmem %s62_s13, 1024  ;;  %p1936_p11 = scmp.lt.s32.totalorder %s62_s13, %s62_s13 }
  0x1c   :  { %p1932_p10 = scmp.ne.s32.totalorder %s62_s13, %s1931_s7  ;;  %p1937_p12 = scmp.lt.s32.totalorder %s1931_s7, %s1931_s7 }
  0x1e   :  { %p1938_p13 = por %p1937_p12, %p1936_p11 }
  0x20   :  { %p1939_p0 = pnand %p1938_p13, %p1932_p10 }
  0x22   :  { %1942 = shalt.err (!%p1939_p0)
}
  0x23   :  { %67 = dma.hbm_to_vmem [thread:$0]  %s2215_s9, 1024, %s62_s13, [#allocation5], %s1948_s20, %s1948_s20, %s1949_s21  }
  0x24   :  { %1943 = dma.done.wait [#allocation3], 9216  }
  0x25   :  { %1944 = vsyncadd [#allocation3], 4294958080 }
  0x26   :  { %1945 = dma.done.wait [#allocation5], 2048  }
  0x27   :  { %1946 = vsyncadd [#allocation5], 4294965248  ;;  %v1954_v0 = vmov 0   ;;  %v1730_v1 = vld [vmem:[#allocation2 + $0xac] ss:$12 sps:$4 sm:$0xff]   ;;  %v80_v42 = vld [vmem:[%s2206_s0] sm:$0xff] }
  0x28   :  { %663 = vmatprep.mubr.bf16.mxu1 %v1954_v0  ;;  %v1732_v2 = vld [vmem:[#allocation2 + $0xa8] ss:$12 sps:$4 sm:$0xff]   ;;  %590 = vmatprep.subr.bf16.mxu0 %v1730_v1  ;;  %v1735_v4 = vld [vmem:[#allocation2 + $0x90] ss:$12 sps:$4 sm:$0xff]   ;;  %v1738_v6 = vld [vmem:[#allocation2 + $0x78] ss:$12 sps:$4 sm:$0xff]   ;;  %v1405_v44 = vcombine.high %v80_v42, %v80_v42 }
  0x29   :  { %v1733_v3 = vld [vmem:[#allocation2 + $0x94] ss:$12 sps:$4 sm:$0xff]   ;;  %591 = vmatpush1.bf16.msra.mxu0 %v1732_v2  ;;  %v1736_v5 = vld [vmem:[#allocation2 + $0x7c] ss:$12 sps:$4 sm:$0xff]   ;;  %v1739_v7 = vld [vmem:[#allocation2 + $0x64] ss:$12 sps:$4 sm:$0xff]  }
  0x2a   :  { %592 = vmatprep.subr.bf16.mxu0 %v1733_v3  ;;  %v1747_v8 = vld [vmem:[#allocation2 + $0x22c] ss:$12 sps:$4 sm:$0xff]   ;;  %v1750_v9 = vld [vmem:[#allocation2 + $0x228] ss:$12 sps:$4 sm:$0xff]   ;;  %v1756_v12 = vld [vmem:[#allocation2 + $0x210] ss:$12 sps:$4 sm:$0xff]   ;;  %622 = vmatprep.mubr.bf16.mxu0 %v1405_v44  ;;  %v1404_v3 = vcombine.low %v80_v42, %v80_v42  ;;  %v180_v42 = vlaneseq }
  0x2b   :  { %631 = vmatprep.subr.bf16.mxu1 %v1747_v8  ;;  %v1741_v10 = vld [vmem:[#allocation2 + $0x60] ss:$12 sps:$4 sm:$0xff]   ;;  %v1759_v14 = vld [vmem:[#allocation2 + $0x1fc] ss:$12 sps:$4 sm:$0xff]   ;;  %v1762_v16 = vld [vmem:[#allocation2 + $0x1f8] ss:$12 sps:$4 sm:$0xff]  }
  0x2c   :  { %632 = vmatpush1.bf16.msra.mxu1 %v1750_v9  ;;  %v1753_v11 = vld [vmem:[#allocation2 + $0x214] ss:$12 sps:$4 sm:$0xff]   ;;  %v1742_v13 = vld [vmem:[#allocation2 + $0x4c] ss:$12 sps:$4 sm:$0xff]   ;;  %v1765_v18 = vld [vmem:[#allocation2 + $0x1e4] ss:$12 sps:$4 sm:$0xff]  }
  0x2d   :  { %593 = vmatpush1.bf16.msra.mxu0 %v1735_v4  ;;  %633 = vmatprep.subr.bf16.mxu1 %v1753_v11  ;;  %v1744_v15 = vld [vmem:[#allocation2 + $0x48] ss:$12 sps:$4 sm:$0xff]   ;;  %v1749_v19 = vld [vmem:[#allocation2 + $0x30] ss:$12 sps:$4 sm:$0xff]   ;;  %v1768_v21 = vld [vmem:[#allocation2 + $0x1e0] ss:$12 sps:$4 sm:$0xff]  }
  0x2e   :  { %594 = vmatprep.subr.bf16.mxu0 %v1736_v5  ;;  %v1745_v17 = vld [vmem:[#allocation2 + $0x34] ss:$12 sps:$4 sm:$0xff]   ;;  %v1751_v20 = vld [vmem:[#allocation2 + $0x1c] ss:$12 sps:$4 sm:$0xff]   ;;  %v1771_v22 = vld [vmem:[#allocation2 + $0x1cc] ss:$12 sps:$4 sm:$0xff]  }
  0x2f   :  { %v1755_v23 = vld [vmem:[#allocation2 + $0x18] ss:$12 sps:$4 sm:$0xff]   ;;  %v1774_v24 = vld [vmem:[#allocation2 + $0x1c8] ss:$12 sps:$4 sm:$0xff]   ;;  %v1761_v27 = vld [vmem:[#allocation2] ss:$12 sps:$4 sm:$0xff]  }
  0x30   :  { %634 = vmatpush1.bf16.msra.mxu1 %v1756_v12  ;;  %v1757_v25 = vld [vmem:[#allocation2 + $0x4] ss:$12 sps:$4 sm:$0xff]   ;;  %v1777_v26 = vld [vmem:[#allocation2 + $0x1b4] ss:$12 sps:$4 sm:$0xff]   ;;  %v1763_v28 = vld [vmem:[#allocation2 + $0x16c] ss:$12 sps:$4 sm:$0xff]  }
  0x31   :  { %595 = vmatpush1.bf16.msra.mxu0 %v1738_v6  ;;  %635 = vmatprep.subr.bf16.mxu1 %v1759_v14  ;;  %v1780_v29 = vld [vmem:[#allocation2 + $0x1b0] ss:$12 sps:$4 sm:$0xff]   ;;  %v1767_v31 = vld [vmem:[#allocation2 + $0x168] ss:$12 sps:$4 sm:$0xff]   ;;  %v1786_v33 = vld [vmem:[#allocation2 + $0x198] ss:$12 sps:$4 sm:$0xff]  }
  0x32   :  { %596 = vmatprep.subr.bf16.mxu0 %v1739_v7  ;;  %v1783_v30 = vld [vmem:[#allocation2 + $0x19c] ss:$12 sps:$4 sm:$0xff]   ;;  %v1769_v32 = vld [vmem:[#allocation2 + $0x154] ss:$12 sps:$4 sm:$0xff]   ;;  %v1789_v34 = vld [vmem:[#allocation2 + $0x184] ss:$12 sps:$4 sm:$0xff]  }
  0x33   :  { %v1773_v35 = vld [vmem:[#allocation2 + $0x150] ss:$12 sps:$4 sm:$0xff]   ;;  %v1792_v37 = vld [vmem:[#allocation2 + $0x180] ss:$12 sps:$4 sm:$0xff]   ;;  %v1779_v39 = vld [vmem:[#allocation2 + $0x138] ss:$12 sps:$4 sm:$0xff]  }
  0x34   :  { %636 = vmatpush1.bf16.msra.mxu1 %v1762_v16  ;;  %v1775_v36 = vld [vmem:[#allocation2 + $0x13c] ss:$12 sps:$4 sm:$0xff]   ;;  %v1781_v40 = vld [vmem:[#allocation2 + $0x124] ss:$12 sps:$4 sm:$0xff]   ;;  %v1785_v46 = vld [vmem:[#allocation2 + $0x120] ss:$12 sps:$4 sm:$0xff]  }
  0x35   :  { %597 = vmatpush1.bf16.msra.mxu0 %v1741_v10  ;;  %637 = vmatprep.subr.bf16.mxu1 %v1765_v18  ;;  %v1795_v38 = vld [vmem:[#allocation2 + $0x170] ss:$12 sps:$4 sm:$0xff]   ;;  %v2029_v41 = vld [vmem:[%s2206_s0 + $0x8] ss:$0 sps:$4 sm:$0xff]   ;;  %v1801_v45 = vld [vmem:[#allocation2 + $0x158] ss:$12 sps:$4 sm:$0xff]  }
  0x36   :  { %598 = vmatprep.subr.bf16.mxu0 %v1742_v13  ;;  %v1798_v43 = vld [vmem:[#allocation2 + $0xb0] ss:$12 sps:$4 sm:$0xff]   ;;  %v1787_v47 = vld [vmem:[#allocation2 + $0x10c] ss:$12 sps:$4 sm:$0xff]   ;;  %v1791_v50 = vld [vmem:[#allocation2 + $0x108] ss:$12 sps:$4 sm:$0xff]  }
  0x37   :  { %v1803_v48 = vld [vmem:[#allocation2 + $0x98] ss:$12 sps:$4 sm:$0xff]   ;;  %v1806_v49 = vld [vmem:[#allocation2 + $0x140] ss:$12 sps:$4 sm:$0xff]   ;;  %v1811_v53 = vld [vmem:[#allocation2 + $0x128] ss:$12 sps:$4 sm:$0xff]  }
  0x38   :  { %638 = vmatpush1.bf16.msra.mxu1 %v1768_v21  ;;  %v1793_v51 = vld [vmem:[#allocation2 + $0xf4] ss:$12 sps:$4 sm:$0xff]   ;;  %v1796_v54 = vld [vmem:[#allocation2 + $0xf0] ss:$12 sps:$4 sm:$0xff]   ;;  %v1802_v58 = vld [vmem:[#allocation2 + $0xd8] ss:$12 sps:$4 sm:$0xff]  }
  0x39   :  { %599 = vmatpush1.bf16.msra.mxu0 %v1744_v15  ;;  %639 = vmatprep.subr.bf16.mxu1 %v1771_v22  ;;  %v1808_v52 = vld [vmem:[#allocation2 + $0x80] ss:$12 sps:$4 sm:$0xff]   ;;  %v1799_v55 = vld [vmem:[#allocation2 + $0xdc] ss:$12 sps:$4 sm:$0xff]   ;;  %v1804_v59 = vld [vmem:[#allocation2 + $0xc4] ss:$12 sps:$4 sm:$0xff]  }
  0x3a   :  { %600 = vmatprep.subr.bf16.mxu0 %v1745_v17  ;;  %v1812_v56 = vld [vmem:[#allocation2 + $0x68] ss:$12 sps:$4 sm:$0xff]   ;;  %v1814_v57 = vld [vmem:[#allocation2 + $0x110] ss:$12 sps:$4 sm:$0xff]   ;;  %v1817_v61 = vld [vmem:[#allocation2 + $0xf8] ss:$12 sps:$4 sm:$0xff]  }
  0x3b   :  { %v1815_v60 = vld [vmem:[#allocation2 + $0x50] ss:$12 sps:$4 sm:$0xff]   ;;  %v1807_v62 = vld [vmem:[#allocation2 + $0xc0] ss:$12 sps:$4 sm:$0xff]   ;;  %v1818_v63 = vld [vmem:[#allocation2 + $0x38] ss:$12 sps:$4 sm:$0xff]  }
  0x3c   :  { %640 = vmatpush1.bf16.msra.mxu1 %v1774_v24  ;;  %v1820_v0 = vld [vmem:[#allocation2 + $0xe0] ss:$12 sps:$4 sm:$0xff]   ;;  %v1813_v1 = vld [vmem:[#allocation2 + $0x230] ss:$12 sps:$4 sm:$0xff]   ;;  %v1823_v4 = vld [vmem:[#allocation2 + $0xc8] ss:$12 sps:$4 sm:$0xff]  }
  0x3d   :  { %601 = vmatpush1.bf16.msra.mxu0 %v1749_v19  ;;  %641 = vmatprep.subr.bf16.mxu1 %v1777_v26  ;;  %v1821_v2 = vld [vmem:[#allocation2 + $0x20] ss:$12 sps:$4 sm:$0xff]   ;;  %v1955_v5 = vmov 0.0   ;;  %v1816_v6 = vld [vmem:[#allocation2 + $0x218] ss:$12 sps:$4 sm:$0xff]   ;;  %vm1956_vm0 = vmmov 0  }
  0x3e   :  { %602 = vmatprep.subr.bf16.mxu0 %v1751_v20  ;;  %v1824_v7 = vld [vmem:[#allocation2 + $0x8] ss:$12 sps:$4 sm:$0xff]   ;;  %v1829_v8 = vld [vmem:[%s2209_s3 + $0x78] sm:$0xff]   ;;  %v1819_v9 = vld [vmem:[#allocation2 + $0x200] ss:$12 sps:$4 sm:$0xff]  }
  0x3f   :  { %v1830_v10 = vld [vmem:[%s2209_s3 + $0x38] sm:$0xff]   ;;  %v1831_v11 = vld [vmem:[%s2209_s3 + $0x70] sm:$0xff]   ;;  %v1833_v14 = vld [vmem:[%s2209_s3 + $0x68] sm:$0xff]  }
  0x40   :  { %642 = vmatpush1.bf16.msra.mxu1 %v1780_v29  ;;  %v1822_v12 = vld [vmem:[#allocation2 + $0x1e8] ss:$12 sps:$4 sm:$0xff]   ;;  %v1825_v15 = vld [vmem:[#allocation2 + $0x1d0] ss:$12 sps:$4 sm:$0xff]   ;;  %v1826_v16 = vld [vmem:[#allocation2 + $0x1b8] ss:$12 sps:$4 sm:$0xff]  }
  0x41   :  { %603 = vmatpush1.bf16.msra.mxu0 %v1755_v23  ;;  %643 = vmatprep.subr.bf16.mxu1 %v1783_v30  ;;  %v1832_v13 = vld [vmem:[%s2209_s3 + $0x30] sm:$0xff]   ;;  %v1827_v17 = vld [vmem:[#allocation2 + $0x1a0] ss:$12 sps:$4 sm:$0xff]   ;;  %v1837_v22 = vld [vmem:[%s2209_s3 + $0x58] sm:$0xff]  }
  0x42   :  { %604 = vmatprep.subr.bf16.mxu0 %v1757_v25  ;;  %v1828_v18 = vld [vmem:[#allocation2 + $0x188] ss:$12 sps:$4 sm:$0xff]   ;;  %v1835_v20 = vld [vmem:[%s2209_s3 + $0x60] sm:$0xff]   ;;  %v1838_v23 = vld [vmem:[%s2209_s3 + $0x18] sm:$0xff]  }
  0x43   :  { %v1834_v19 = vld [vmem:[%s2209_s3 + $0x28] sm:$0xff]   ;;  %v1836_v21 = vld [vmem:[%s2209_s3 + $0x20] sm:$0xff]   ;;  %v1839_v24 = vld [vmem:[%s2209_s3 + $0x50] sm:$0xff]  }
  0x44   :  { %644 = vmatpush1.bf16.msra.mxu1 %v1786_v33  ;;  %v1840_v25 = vld [vmem:[%s2209_s3 + $0x10] sm:$0xff]   ;;  %v1841_v26 = vld [vmem:[%s2209_s3 + $0x48] sm:$0xff]   ;;  %v1844_v29 = vld [vmem:[%s2209_s3 + $0xb8] sm:$0xff]  }
  0x45   :  { %605 = vmatpush1.bf16.msra.mxu0 %v1761_v27  ;;  %645 = vmatprep.subr.bf16.mxu1 %v1789_v34  ;;  %v1842_v27 = vld [vmem:[%s2209_s3 + $0x8] sm:$0xff]   ;;  %v1845_v30 = vld [vmem:[%s2209_s3] sm:$0xff]   ;;  %v1849_v34 = vld [vmem:[%s2209_s3 + $0x98] sm:$0xff]  }
  0x46   :  { %606 = vmatprep.subr.bf16.mxu0 %v1763_v28  ;;  %v1843_v28 = vld [vmem:[%s2209_s3 + $0x40] sm:$0xff]  }
  0x47   :  { %v1848_v33 = vld [vmem:[%s2209_s3 + $0xa0] sm:$0xff]  }
  0x48   :  { %646 = vmatpush1.bf16.msra.mxu1 %v1792_v37  ;;  %v1852_v37 = vld [vmem:[%s2209_s3 + $0x80] sm:$0xff]  }
  0x49   :  { %607 = vmatpush2.bf16.msra.mxu0 %v1767_v31  ;;  %1531 = vmatprep.subr.bf16.mxu1 %v1795_v38  ;;  %v1846_v31 = vld [vmem:[%s2209_s3 + $0xb0] sm:$0xff]  }
  0x4a   :  { %608 = vmatprep.subr.bf16.mxu0 %v1769_v32  ;;  %v1847_v32 = vld [vmem:[%s2209_s3 + $0xa8] sm:$0xff]  }
  0x4b   :  { %664 = vmatmul.mubr.bf16.vlgmr.msra.gmra.mxu1 %v2029_v41 }
  0x4c   :  { %1532 = vmatpush3.bf16.msra.mxu1 %v1798_v43  ;;  %704 = vmatprep.mubr.bf16.mxu1 %v1405_v44  ;;  %v181_v43 = vshrl.u32 %v180_v42, 7 }
  0x4d   :  { %609 = vmatpush2.bf16.msra.mxu0 %v1773_v35  ;;  %1533 = vmatprep.subr.bf16.mxu1 %v1801_v45  ;;  %v1850_v35 = vld [vmem:[%s2209_s3 + $0x90] sm:$0xff]   ;;  %v178_v45 = vld [vmem:[%s2208_s2] sm:$0x7] }
  0x4e   :  { %610 = vmatprep.subr.bf16.mxu0 %v1775_v36  ;;  %v1851_v36 = vld [vmem:[%s2209_s3 + $0x88] sm:$0xff]   ;;  %v182_v44 = vsub.s32 0, %v181_v43 }
  0x50   :  { %1534 = vmatpush3.bf16.msra.mxu1 %v1803_v48 }
  0x51   :  { %611 = vmatpush2.bf16.msra.mxu0 %v1779_v39  ;;  %1535 = vmatprep.subr.bf16.mxu1 %v1806_v49 }
  0x52   :  { %612 = vmatprep.subr.bf16.mxu0 %v1781_v40 }
  0x54   :  { %1536 = vmatpush3.bf16.msra.mxu1 %v1808_v52 }
  0x55   :  { %613 = vmatpush2.bf16.msra.mxu0 %v1785_v46  ;;  %1537 = vmatprep.subr.bf16.mxu1 %v1811_v53  ;;  %v186_v46 = vsub.s32 1, %v181_v43 }
  0x56   :  { %614 = vmatprep.subr.bf16.mxu0 %v1787_v47  ;;  %v183_v47 = vrot.slane %v178_v45, %v182_v44  ;;  %v1869_v44 = vld [vmem:[#allocation6 + $0x38] sm:$0xff]  }
  0x57   :  { %v187_v48 = vrot.slane %v178_v45, %v186_v46  ;;  %v1871_v46 = vld [vmem:[#allocation6 + $0x28] sm:$0xff]  }
  0x58   :  { %1538 = vmatpush3.bf16.msra.mxu1 %v1812_v56 }
  0x59   :  { %615 = vmatpush2.bf16.msra.mxu0 %v1791_v50  ;;  %1539 = vmatprep.subr.bf16.mxu1 %v1814_v57 }
  0x5a   :  { %616 = vmatprep.subr.bf16.mxu0 %v1793_v51 }
  0x5c   :  { %1540 = vmatpush3.bf16.msra.mxu1 %v1815_v60 }
  0x5d   :  { %617 = vmatpush2.bf16.msra.mxu0 %v1796_v54  ;;  %1541 = vmatprep.subr.bf16.mxu1 %v1817_v61 }
  0x5e   :  { %618 = vmatprep.subr.bf16.mxu0 %v1799_v55 }
  0x60   :  { %1542 = vmatpush3.bf16.msra.mxu1 %v1818_v63 }
  0x61   :  { %619 = vmatpush2.bf16.msra.mxu0 %v1802_v58  ;;  %1543 = vmatprep.subr.bf16.mxu1 %v1820_v0 }
  0x62   :  { %620 = vmatprep.subr.bf16.mxu0 %v1804_v59 }
  0x64   :  { %1544 = vmatpush3.bf16.msra.mxu1 %v1821_v2 }
  0x65   :  { %621 = vmatpush2.bf16.msra.mxu0 %v1807_v62  ;;  %1545 = vmatprep.subr.bf16.mxu1 %v1823_v4 }
  0x66   :  { %1620 = vmatprep.subr.bf16.mxu0 %v1955_v5 }
  0x68   :  { %623 = vmatmul.mubr.bf16.vlgmr.msra.gmra.mxu0 %v1404_v3  ;;  %1546 = vmatpush3.bf16.msra.mxu1 %v1824_v7 }
  0x69   :  { %1621 = vmatpush3.bf16.msra.mxu0 %v1813_v1  ;;  %1636 = vmatprep.mubr.msk.bf16.mxu0 %vm1956_vm0, %v1955_v5  ;;  %v190_v1 = vsub.s32 2, %v181_v43  ;;  %v1868_v43 = vld [vmem:[#allocation4] sm:$0xff]  }
  0x6a   :  { %1622 = vmatprep.subr.bf16.mxu0 %v1955_v5  ;;  %1562 = vmatprep.subr.bf16.mxu1 %v1829_v8 }
  0x6b   :  { %705 = vmatmul.mubr.bf16.vlgmr.msra.gmra.mxu1 %v1404_v3  ;;  %v191_v3 = vrot.slane %v178_v45, %v190_v1  ;;  %v1870_v45 = vld [vmem:[#allocation6 + $0x30] sm:$0xff]  }
  0x6c   :  { %1563 = vmatpush3.bf16.msra.mxu1 %v1830_v10 }
  0x6d   :  { %1623 = vmatpush3.bf16.msra.mxu0 %v1816_v6  ;;  %1564 = vmatprep.subr.bf16.mxu1 %v1831_v11 }
  0x6e   :  { %1624 = vmatprep.subr.bf16.mxu0 %v1955_v5 }
  0x70   :  { %1565 = vmatpush3.bf16.msra.mxu1 %v1832_v13  ;;  %v1853_v13 = vld [vmem:[%s2211_s5 + $0x38] sm:$0xff]  }
  0x71   :  { %1625 = vmatpush3.bf16.msra.mxu0 %v1819_v9  ;;  %1566 = vmatprep.subr.bf16.mxu1 %v1833_v14  ;;  %v1854_v14 = vld [vmem:[%s2211_s5 + $0x30] sm:$0xff]  }
  0x72   :  { %1626 = vmatprep.subr.bf16.mxu0 %v1955_v5 }
  0x74   :  { %1567 = vmatpush3.bf16.msra.mxu1 %v1834_v19  ;;  %v1859_v19 = vld [vmem:[%s2211_s5 + $0x8] sm:$0xff]  }
  0x75   :  { %1627 = vmatpush3.bf16.msra.mxu0 %v1822_v12  ;;  %1568 = vmatprep.subr.bf16.mxu1 %v1835_v20  ;;  %v1860_v20 = vld [vmem:[%s2211_s5] sm:$0xff]  }
  0x76   :  { %1628 = vmatprep.subr.bf16.mxu0 %v1955_v5 }
  0x78   :  { %1569 = vmatpush3.bf16.msra.mxu1 %v1836_v21  ;;  %v1861_v21 = vld [vmem:[#allocation4 + $0x38] sm:$0xff]  }
  0x79   :  { %1629 = vmatpush3.bf16.msra.mxu0 %v1825_v15  ;;  %1570 = vmatprep.subr.bf16.mxu1 %v1837_v22  ;;  %v1855_v15 = vld [vmem:[%s2211_s5 + $0x28] sm:$0xff]   ;;  %v1862_v22 = vld [vmem:[#allocation4 + $0x30] sm:$0xff]  }
  0x7a   :  { %1630 = vmatprep.subr.bf16.mxu0 %v1955_v5 }
  0x7c   :  { %1571 = vmatpush3.bf16.msra.mxu1 %v1838_v23  ;;  %v1863_v23 = vld [vmem:[#allocation4 + $0x28] sm:$0xff]  }
  0x7d   :  { %1631 = vmatpush3.bf16.msra.mxu0 %v1826_v16  ;;  %1572 = vmatprep.subr.bf16.mxu1 %v1839_v24  ;;  %v1856_v16 = vld [vmem:[%s2211_s5 + $0x20] sm:$0xff]  }
  0x7e   :  { %1632 = vmatprep.subr.bf16.mxu0 %v1955_v5  ;;  %v1864_v24 = vld [vmem:[#allocation4 + $0x20] sm:$0xff]  }
  0x80   :  { %1573 = vmatpush3.bf16.msra.mxu1 %v1840_v25  ;;  %v1865_v25 = vld [vmem:[#allocation4 + $0x18] sm:$0xff]  }
  0x81   :  { %1633 = vmatpush3.bf16.msra.mxu0 %v1827_v17  ;;  %1574 = vmatprep.subr.bf16.mxu1 %v1841_v26  ;;  %v1857_v17 = vld [vmem:[%s2211_s5 + $0x18] sm:$0xff]   ;;  %v1866_v26 = vld [vmem:[#allocation4 + $0x10] sm:$0xff]  }
  0x82   :  { %1634 = vmatprep.subr.bf16.mxu0 %v1955_v5 }
  0x84   :  { %1575 = vmatpush3.bf16.msra.mxu1 %v1842_v27 }
  0x85   :  { %1635 = vmatpush3.bf16.msra.mxu0 %v1828_v18  ;;  %1576 = vmatprep.subr.bf16.mxu1 %v1843_v28  ;;  %v1858_v18 = vld [vmem:[%s2211_s5 + $0x10] sm:$0xff]  }
  0x86   :  { %1640 = vmatprep.subr.bf16.mxu0 %v1955_v5 }
  0x88   :  { %1637 = vmatmul.mubr.bf16.vlgmr.msra.gmra.mxu0 %v2029_v41  ;;  %1577 = vmatpush3.bf16.msra.mxu1 %v1845_v30 }
  0x89   :  { %1656 = vmatprep.mubr.msk.bf16.mxu0 %vm1956_vm0, %v1955_v5  ;;  %1641 = vmatpush3.bf16.msra.mxu0 %v1844_v29 }
  0x8a   :  { %1642 = vmatprep.subr.bf16.mxu0 %v1955_v5  ;;  %1660 = vmatprep.subr.bf16.mxu1 %v1955_v5 }
  0x8d   :  { %1643 = vmatpush3.bf16.msra.mxu0 %v1846_v31 }
  0x8e   :  { %1644 = vmatprep.subr.bf16.mxu0 %v1955_v5 }
  0x91   :  { %1645 = vmatpush3.bf16.msra.mxu0 %v1847_v32  ;;  %v1479_v32 = vld [vmem:[%s2210_s4] ss:$0 sm:$0xff] }
  0x92   :  { %1646 = vmatprep.subr.bf16.mxu0 %v1955_v5 }
  0x95   :  { %1647 = vmatpush3.bf16.msra.mxu0 %v1848_v33 }
  0x96   :  { %1648 = vmatprep.subr.bf16.mxu0 %v1955_v5 }
  0x99   :  { %1649 = vmatpush3.bf16.msra.mxu0 %v1849_v34 }
  0x9a   :  { %1650 = vmatprep.subr.bf16.mxu0 %v1955_v5 }
  0x9d   :  { %1651 = vmatpush3.bf16.msra.mxu0 %v1850_v35 }
  0x9e   :  { %1652 = vmatprep.subr.bf16.mxu0 %v1955_v5 }
  0xa1   :  { %1653 = vmatpush3.bf16.msra.mxu0 %v1851_v36 }
  0xa2   :  { %1654 = vmatprep.subr.bf16.mxu0 %v1955_v5 }
  0xa5   :  { %1655 = vmatpush3.bf16.msra.mxu0 %v1852_v37 }
  0xa6   :  { %1680 = vmatprep.subr.bf16.mxu0 %v1955_v5 }
 0x10b   :  { %v665_v38 = vpop.f32.mrf.mxu1 }
 0x10d   :  { %v667_v39 = vpop.f32.mrf.mxu1 }
 0x10f   :  { %v669_v40 = vpop.f32.mrf.mxu1 }
 0x111   :  { %v670_v41 = vpop.f32.mrf.mxu1 }
 0x112   :  { %v1867_v41 = vld [vmem:[#allocation4 + $0x8] sm:$0xff]  }
 0x128   :  { %v624_v49 = vpop.f32.mrf.mxu0 }
 0x129   :  { %v625_v50 = vadd.f32 %v624_v49, %v183_v47  ;;  %v1872_v47 = vld [vmem:[#allocation6 + $0x20] sm:$0xff]   ;;  %v1874_v49 = vld [vmem:[#allocation6 + $0x10] sm:$0xff]  }
 0x12a   :  { %v626_v51 = vpop.f32.mrf.mxu0 }
 0x12b   :  { %v666_v52 = vadd.f32 %v665_v38, %v625_v50  ;;  %v627_v53 = vadd.f32 %v626_v51, %v187_v48  ;;  %v1547_v59 = vpop.f32.mrf.mxu1  ;;  %v1873_v48 = vld [vmem:[#allocation6 + $0x18] sm:$0xff]   ;;  %v1504_v50 = vld [vmem:[%s2212_s6] ss:$0 sm:$0xff] }
 0x12c   :  { %v628_v54 = vpop.f32.mrf.mxu0 }
 0x12d   :  { %v668_v55 = vadd.f32 %v667_v39, %v627_v53  ;;  %v752_v56 = vmax.f32 %v666_v52, 0.0  ;;  %v1548_v62 = vpop.f32.mrf.mxu1 }
 0x12e   :  { %v629_v57 = vpop.f32.mrf.mxu0  ;;  %v1549_v2 = vadd.f32 %v1548_v62, %v1547_v59  ;;  %v1876_v59 = vld [vmem:[#allocation6] sm:$0xff]  }
 0x12f   :  { %v753_v58 = vmax.f32 %v668_v55, 0.0  ;;  %v755_v61 = vpack.c.bf16 %v752_v56, %v752_v56  ;;  %v1550_v63 = vpop.f32.mrf.mxu1 }
 0x130   :  { %v707_v4 = vadd.f32 %v1549_v2, %v191_v3 }
 0x131   :  { %v756_v60 = vpack.c.bf16 %v753_v58, %v753_v58  ;;  %v1551_v0 = vpop.f32.mrf.mxu1  ;;  %v1875_v58 = vld [vmem:[#allocation6 + $0x8] sm:$0xff]  }
 0x133   :  { %989 = vmatprep.mubr.bf16.mxu1 %v756_v60  ;;  %v1513_v60 = vld [vmem:[%s2214_s8] ss:$0 sm:$0xff] }
 0x134   :  { %990 = vmatmul.mubr.bf16.vlgmr.msra.gmra.mxu1 %v755_v61 }
 0x135   :  { %1676 = vmatprep.mubr.msk.bf16.mxu1 %vm1956_vm0, %v1955_v5  ;;  %1661 = vmatpush3.bf16.msra.mxu1 %v1853_v13 }
 0x136   :  { %1662 = vmatprep.subr.bf16.mxu1 %v1955_v5 }
 0x139   :  { %1663 = vmatpush3.bf16.msra.mxu1 %v1854_v14 }
 0x13a   :  { %1664 = vmatprep.subr.bf16.mxu1 %v1955_v5 }
 0x13d   :  { %1665 = vmatpush3.bf16.msra.mxu1 %v1855_v15 }
 0x13e   :  { %1666 = vmatprep.subr.bf16.mxu1 %v1955_v5 }
 0x141   :  { %1667 = vmatpush3.bf16.msra.mxu1 %v1856_v16 }
 0x142   :  { %1668 = vmatprep.subr.bf16.mxu1 %v1955_v5 }
 0x145   :  { %1669 = vmatpush3.bf16.msra.mxu1 %v1857_v17 }
 0x146   :  { %1670 = vmatprep.subr.bf16.mxu1 %v1955_v5 }
 0x148   :  { %v746_v6 = vpop.f32.mrf.mxu0 }
 0x149   :  { %v747_v7 = vadd.f32 %v746_v6, %v707_v4  ;;  %1671 = vmatpush3.bf16.msra.mxu1 %v1858_v18  ;;  %v1377_v4 = vand.u32 127, %v180_v42 }
 0x14a   :  { %v1638_v8 = vpop.f32.mrf.mxu0  ;;  %1672 = vmatprep.subr.bf16.mxu1 %v1955_v5 }
 0x14b   :  { %v754_v9 = vmax.f32 %v747_v7, 0.0  ;;  %vm1390_vm1 = vcmp.eq.s32.totalorder %v1377_v4, 81  ;;  %vm1378_vm2 = vcmp.lt.s32.totalorder %v1377_v4, 81 }
 0x14c   :  { %v749_v10 = vpop.f32.mrf.mxu0 }
 0x14d   :  { %v757_v11 = vpack.c.bf16 %v754_v9, %v754_v9  ;;  %1673 = vmatpush3.bf16.msra.mxu1 %v1859_v19 }
 0x14e   :  { %v1639_v12 = vpop.f32.mrf.mxu0  ;;  %1674 = vmatprep.subr.bf16.mxu1 %v1955_v5 }
 0x14f   :  { %1657 = vmatmul.mubr.bf16.vlgmr.msra.gmra.mxu0 %v757_v11 }
 0x150   :  { %1696 = vmatprep.mubr.msk.bf16.mxu0 %vm1956_vm0, %v1955_v5  ;;  %1681 = vmatpush3.bf16.msra.mxu0 %v1861_v21 }
 0x151   :  { %1675 = vmatpush3.bf16.msra.mxu1 %v1860_v20  ;;  %1682 = vmatprep.subr.bf16.mxu0 %v1955_v5 }
 0x152   :  { %1700 = vmatprep.subr.bf16.mxu1 %v1955_v5 }
 0x154   :  { %1683 = vmatpush3.bf16.msra.mxu0 %v1862_v22 }
 0x155   :  { %1684 = vmatprep.subr.bf16.mxu0 %v1955_v5 }
 0x158   :  { %1685 = vmatpush3.bf16.msra.mxu0 %v1863_v23 }
 0x159   :  { %1686 = vmatprep.subr.bf16.mxu0 %v1955_v5 }
 0x15c   :  { %1687 = vmatpush3.bf16.msra.mxu0 %v1864_v24 }
 0x15d   :  { %1688 = vmatprep.subr.bf16.mxu0 %v1955_v5 }
 0x160   :  { %1689 = vmatpush3.bf16.msra.mxu0 %v1865_v25 }
 0x161   :  { %1690 = vmatprep.subr.bf16.mxu0 %v1955_v5 }
 0x164   :  { %1691 = vmatpush3.bf16.msra.mxu0 %v1866_v26 }
 0x165   :  { %1692 = vmatprep.subr.bf16.mxu0 %v1955_v5 }
 0x168   :  { %1693 = vmatpush3.bf16.msra.mxu0 %v1867_v41 }
 0x169   :  { %1694 = vmatprep.subr.bf16.mxu0 %v1955_v5 }
 0x16c   :  { %1695 = vmatpush3.bf16.msra.mxu0 %v1868_v43 }
 0x1f4   :  { %v1578_v27 = vpop.f32.mrf.mxu1 }
 0x1f6   :  { %v1579_v28 = vpop.f32.mrf.mxu1 }
 0x1f7   :  { %v1580_v31 = vadd.f32 %v1579_v28, %v1578_v27 }
 0x1f8   :  { %v1581_v29 = vpop.f32.mrf.mxu1 }
 0x1f9   :  { %v992_v33 = vadd.f32 %v1580_v31, %v1479_v32 }
 0x1fa   :  { %v1582_v30 = vpop.f32.mrf.mxu1 }
 0x20f   :  { %v1031_v34 = vpop.f32.mrf.mxu0 }
 0x210   :  { %v1032_v35 = vadd.f32 %v1031_v34, %v992_v33 }
 0x211   :  { %v1658_v36 = vpop.f32.mrf.mxu0 }
 0x212   :  { %v1037_v37 = vmax.f32 %v1032_v35, 0.0 }
 0x213   :  { %v1034_v38 = vpop.f32.mrf.mxu0 }
 0x214   :  { %v1038_v39 = vpack.c.bf16 %v1037_v37, %v1037_v37 }
 0x215   :  { %v1659_v40 = vpop.f32.mrf.mxu0 }
 0x216   :  { %1677 = vmatmul.mubr.bf16.vlgmr.msra.gmra.mxu1 %v1038_v39 }
 0x217   :  { %1716 = vmatprep.mubr.msk.bf16.mxu1 %vm1956_vm0, %v1955_v5  ;;  %1701 = vmatpush3.bf16.msra.mxu1 %v1869_v44 }
 0x218   :  { %1702 = vmatprep.subr.bf16.mxu1 %v1955_v5 }
 0x21b   :  { %1703 = vmatpush3.bf16.msra.mxu1 %v1870_v45 }
 0x21c   :  { %1704 = vmatprep.subr.bf16.mxu1 %v1955_v5 }
 0x21f   :  { %1705 = vmatpush3.bf16.msra.mxu1 %v1871_v46 }
 0x220   :  { %1706 = vmatprep.subr.bf16.mxu1 %v1955_v5 }
 0x223   :  { %1707 = vmatpush3.bf16.msra.mxu1 %v1872_v47 }
 0x224   :  { %1708 = vmatprep.subr.bf16.mxu1 %v1955_v5 }
 0x227   :  { %1709 = vmatpush3.bf16.msra.mxu1 %v1873_v48 }
 0x228   :  { %1710 = vmatprep.subr.bf16.mxu1 %v1955_v5 }
 0x22b   :  { %1711 = vmatpush3.bf16.msra.mxu1 %v1874_v49 }
 0x22c   :  { %1712 = vmatprep.subr.bf16.mxu1 %v1955_v5 }
 0x22f   :  { %1713 = vmatpush3.bf16.msra.mxu1 %v1875_v58 }
 0x230   :  { %1714 = vmatprep.subr.bf16.mxu1 %v1955_v5  ;;  %v1522_v5 = vld [vmem:[%s2216_s10] ss:$0 sm:$0xff] }
 0x233   :  { %1715 = vmatpush3.bf16.msra.mxu1 %v1876_v59 }
 0x2d6   :  { %v1144_v51 = vpop.f32.mrf.mxu1 }
 0x2d7   :  { %v1145_v52 = vadd.f32 %v1504_v50, %v1144_v51 }
 0x2d8   :  { %v1678_v53 = vpop.f32.mrf.mxu1 }
 0x2d9   :  { %v1150_v54 = vmax.f32 %v1145_v52, 0.0 }
 0x2da   :  { %v1147_v55 = vpop.f32.mrf.mxu1 }
 0x2db   :  { %v1151_v56 = vpack.c.bf16 %v1150_v54, %v1150_v54 }
 0x2dc   :  { %v1679_v57 = vpop.f32.mrf.mxu1 }
 0x2dd   :  { %1697 = vmatmul.mubr.bf16.vlgmr.msra.gmra.mxu0 %v1151_v56 }
 0x39d   :  { %v1257_v61 = vpop.f32.mrf.mxu0 }
 0x39e   :  { %v1258_v62 = vadd.f32 %v1513_v60, %v1257_v61 }
 0x39f   :  { %v1698_v63 = vpop.f32.mrf.mxu0 }
 0x3a0   :  { %v1263_v0 = vmax.f32 %v1258_v62, 0.0 }
 0x3a1   :  { %v1260_v1 = vpop.f32.mrf.mxu0 }
 0x3a2   :  { %v1264_v2 = vpack.c.bf16 %v1263_v0, %v1263_v0 }
 0x3a3   :  { %v1699_v3 = vpop.f32.mrf.mxu0 }
 0x3a4   :  { %1717 = vmatmul.mubr.bf16.vlgmr.msra.gmra.mxu1 %v1264_v2 }
 0x464   :  { %v1370_v6 = vpop.f32.mrf.mxu1 }
 0x465   :  { %v1371_v7 = vadd.f32 %v1522_v5, %v1370_v6 }
 0x466   :  { %v1718_v8 = vpop.f32.mrf.mxu1 }
 0x467   :  { %v1391_v9 = vsel %vm1390_vm1, %v1371_v7, 0.0  ;;  %v1379_v10 = vsel %vm1378_vm2, %v1371_v7, -inf }
 0x468   :  { %1392 = vadd.xlane.f32.xlu1 %v1391_v9  ;;  %1380 = vmax.xlane.f32.xlu0 %v1379_v10  ;;  %v1373_v11 = vpop.f32.mrf.mxu1 }
 0x46a   :  { %v1719_v12 = vpop.f32.mrf.mxu1 }
 0x4f1   :  { %v1381_v13 = vpop.xlane.xlu0 %1380  ;;  %v1393_v17 = vpop.xlane.xlu1 %1392 }
 0x4f2   :  { %v1382_v14 = vsub.f32 %v1379_v10, %v1381_v13 }
 0x4f4   :  { %v1383_v42 = vmul.f32 1.442695, %v1382_v14 }
 0x4f6   :  { %1877 = vpow2.f32 %v1383_v42 }
 0x503   :  { %v1878_v15 = vpop.eup %1877 }
 0x504   :  { %1385 = vadd.xlane.f32.xlu0 %v1878_v15 }
 0x58d   :  { %v1386_v16 = vpop.xlane.xlu0 %1385 }
 0x58e   :  { %1879 = vlog2.f32 %v1386_v16 }
 0x58f   :  { %1881 = vtanh.f32 %v1393_v17 }
 0x59b   :  { %v1880_v18 = vpop.eup %1879 }
 0x59c   :  { %v1388_v19 = vmul.f32 0.6931472, %v1880_v18  ;;  %v1882_v21 = vpop.eup %1881 }
 0x59e   :  { %v1389_v20 = vsub.f32 %v1382_v14, %v1388_v19 }
 0x5a0   :  { %v1395_v22 = vsel %vm1378_vm2, %v1389_v20, 0.0 }
 0x5a1   :  { %v1396_v23 = vsel %vm1390_vm1, %v1882_v21, %v1395_v22 }
 0x5a2   :  { %1397 = vst [vmem:[%s2217_s11] sm:$0xff] %v1396_v23 }
 0x5a3   :  { %1402 = vsyncpa [#allocation3], 1 }
 0x5a4   :  { %1403 = vsyncpa [#allocation5], 1 }

</bundles_post_ra>
